<compile_context>
chip_gen: v5e
topology: v5e:2x2
jax: 0.10.0
libtpu: 0.0.40
codegen_flags: <defaults>
</compile_context>

<pallas_src>
import math

import jax
import jax.numpy as jnp
import numpy as np
from jax import lax
from jax.experimental import pallas as pl
from jax.experimental.pallas import tpu as pltpu


# ----------------------------- Pallas kernel --------------------------------
def _log_encoder_kernel(x_ref, w_ref, pe_ref, o_ref):
    # x_ref : (Bblk, T, C)  bf16  session chunk (channels-last)
    # w_ref : (3C, H)       bf16  unfolded conv weight, rows = [tap0 | tap1 | tap2]
    # pe_ref: (T, H)        f32   positional embedding with conv bias folded in
    # o_ref : (Bblk, T, H)  f32
    bblk, t, c = x_ref.shape
    h = o_ref.shape[-1]

    # Circular taps along T.  Upcast once; the static-shift rolls / concat then
    # follow plain 32-bit layout paths on a tile that is tiny next to the output.
    x = x_ref[...].astype(jnp.float32)                       # (Bblk, T, C)
    x_prev = jnp.roll(x, 1, axis=1)                          # x[(t-1) mod T]  (tap k=0)
    x_next = jnp.roll(x, -1, axis=1)                         # x[(t+1) mod T]  (tap k=2)

    # Unfold so the whole 3-tap conv is ONE MXU dot (K = 3C) instead of three
    # K=C dots: ~3x fewer vmatmul pushes and result pops per grid step.
    x_unf = jnp.concatenate([x_prev, x, x_next], axis=-1)    # (Bblk, T, 3C)

    m = bblk * t                                             # matmul M dim = Bblk*T rows
    acc = jnp.dot(x_unf.reshape(m, 3 * c).astype(jnp.bfloat16), w_ref[...],
                  preferred_element_type=jnp.float32)        # (M, H) f32

    o_ref[...] = (acc.reshape(bblk, t, h) + pe_ref[...]).astype(o_ref.dtype)


def _choose_block_b(B, T, H):
    """Batch-chunk size: target ~1024 matmul rows per step (amortizes the
    ~0.35 us/step pipeline overhead), keep >=2 grid steps when B allows so the
    'parallel' batch axis can shard across both v7x TensorCores, and cap the
    double-buffered f32 output tile to stay well inside scoped VMEM."""
    blk = max(1, min(B, max(1, 1024 // T)))
    if B > 1 and pl.cdiv(B, blk) < 2:
        blk = pl.cdiv(B, 2)
    # double-buffered output tile <= ~8 MiB
    while blk > 1 and blk * T * H * 4 * 2 > (8 << 20):
        blk = max(1, blk // 2)
    return blk


def log_encoder_forward(session, conv_w, conv_b, pe, *, block_b=None):
    """session: (B, T, C) f32; conv_w: (H, C, 3); conv_b: (H,); pe: (T, H)."""
    B, T, C = session.shape
    H = conv_w.shape[0]
    if block_b is None:
        block_b = _choose_block_b(B, T, H)
    grid_b = pl.cdiv(B, block_b)

    # Conv1d weight (H, C, 3) -> (3, C, H) -> (3C, H): row k*C + c, col h holds
    # conv_w[h, c, k]; column block k of x_unf multiplies x_{t-1+k}
    # (matches PyTorch cross-correlation with circular padding=1).
    w_unf = jnp.transpose(conv_w, (2, 1, 0)).reshape(3 * C, H).astype(jnp.bfloat16)
    x_bf16 = session.astype(jnp.bfloat16)
    pe_bias = (pe + conv_b[None, :]).astype(jnp.float32)     # fold conv bias into pe

    return pl.pallas_call(
        _log_encoder_kernel,
        out_shape=jax.ShapeDtypeStruct((B, T, H), jnp.float32),
        grid=(grid_b,),
        in_specs=[
            pl.BlockSpec((block_b, T, C), lambda i: (i, 0, 0)),
            pl.BlockSpec((3 * C, H), lambda i: (0, 0)),      # resident across steps
            pl.BlockSpec((T, H), lambda i: (0, 0)),          # resident across steps
        ],
        out_specs=pl.BlockSpec((block_b, T, H), lambda i: (i, 0, 0)),
        compiler_params=pltpu.CompilerParams(
            dimension_semantics=("parallel",)),
    )(x_bf16, w_unf, pe_bias)


# --------------------------- parameter / pe setup ----------------------------
def make_positional_embedding(seq_len, d_model):
    position = jnp.arange(seq_len, dtype=jnp.float32)[:, None]
    div_term = jnp.exp(jnp.arange(0, d_model, 2, dtype=jnp.float32)
                       * -(math.log(10000.0) / d_model))
    pe = jnp.zeros((seq_len, d_model), jnp.float32)
    pe = pe.at[:, 0::2].set(jnp.sin(position * div_term))
    pe = pe.at[:, 1::2].set(jnp.cos(position * div_term))
    return pe


def reference_forward(session, conv_w, conv_b, pe):
    """Pure-JAX reference: circular Conv1d (cross-correlation, padding=1) via
    explicit circular pad + lax.conv, plus pos-emb/bias add.  Formulated
    independently of the kernel's unfold-matmul."""
    x = jnp.transpose(session, (0, 2, 1))                              # (B, C, T)
    x_pad = jnp.concatenate([x[:, :, -1:], x, x[:, :, :1]], axis=-1)   # circular pad 1
    y = lax.conv_general_dilated(
        x_pad, conv_w, window_strides=(1,), padding='VALID',
        dimension_numbers=('NCH', 'OIH', 'NCH'))                       # (B, H, T)
    return jnp.transpose(y, (0, 2, 1)) + conv_b[None, None, :] + pe[None]


# ----------------------------------- main ------------------------------------
if __name__ == "__main__":
    B, T = 16, 8           # batch, sequence length (block_b=8 -> 2 parallel steps)
    LOG_C = 4              # kwargs['log_c']
    HIDDEN = 128           # kwargs['hidden_size'] (lane-width aligned -> dense vst)

    key = jax.random.PRNGKey(0)
    k_x, k_w, k_b = jax.random.split(key, 3)

    session = jax.random.normal(k_x, (B, T, LOG_C), dtype=jnp.float32)

    # Conv1d(in=LOG_C, out=HIDDEN, kernel_size=3) parameters, deterministic init.
    fan_in = LOG_C * 3
    bound = 1.0 / math.sqrt(fan_in)
    conv_w = jax.random.uniform(k_w, (HIDDEN, LOG_C, 3),
                                minval=-bound, maxval=bound, dtype=jnp.float32)
    conv_b = jax.random.uniform(k_b, (HIDDEN,),
                                minval=-bound, maxval=bound, dtype=jnp.float32)

    pe = make_positional_embedding(T, HIDDEN)   # open_position_embedding=True

    out = jax.block_until_ready(log_encoder_forward(session, conv_w, conv_b, pe))

    # Reference computed from the same bf16-rounded inputs the kernel consumes,
    # so the comparison isolates kernel structure/indexing (tight tolerance).
    sess_bf = session.astype(jnp.bfloat16).astype(jnp.float32)
    w_bf = conv_w.astype(jnp.bfloat16).astype(jnp.float32)
    ref = reference_forward(sess_bf, w_bf, conv_b, pe)
    np.testing.assert_allclose(np.asarray(out), np.asarray(ref),
                               rtol=1e-4, atol=1e-4)

    print("KERNEL_OK")
</pallas_src>

<mosaic_0001>
module attributes {stable_mosaic.version = 11 : i64} {
  func.func @_log_encoder_kernel(%arg0: i32, %arg1: memref<8x8x4xbf16, #tpu.memory_space<vmem>>, %arg2: memref<12x128xbf16, #tpu.memory_space<vmem>>, %arg3: memref<8x128xf32, #tpu.memory_space<vmem>>, %arg4: memref<8x8x128xf32, #tpu.memory_space<vmem>>) attributes {dimension_semantics = [#tpu.dimension_semantics<parallel>], iteration_bounds = array<i64: 2>, scalar_prefetch = 0 : i64, scratch_operands = 0 : i64, tpu.core_type = #tpu.core_type<tc>, window_params = [{transform_indices = @transform_0, window_bounds = array<i64: 8, 8, 4>}, {pipeline_mode = #tpu.pipeline_mode<synchronous>, transform_indices = @transform_1, window_bounds = array<i64: 12, 128>}, {pipeline_mode = #tpu.pipeline_mode<synchronous>, transform_indices = @transform_2, window_bounds = array<i64: 8, 128>}, {transform_indices = @transform_3, window_bounds = array<i64: 8, 8, 128>}]} {
    %c0 = arith.constant 0 : index
    %c0_0 = arith.constant 0 : index
    %c0_1 = arith.constant 0 : index
    %0 = vector.load %arg1[%c0, %c0_0, %c0_1] : memref<8x8x4xbf16, #tpu.memory_space<vmem>>, vector<8x8x4xbf16>
    %1 = arith.extf %0 : vector<8x8x4xbf16> to vector<8x8x4xf32>
    %2 = vector.extract_strided_slice %1 {offsets = [0, 7, 0], sizes = [8, 1, 4], strides = [1, 1, 1]} : vector<8x8x4xf32> to vector<8x1x4xf32>
    %3 = vector.extract_strided_slice %1 {offsets = [0, 0, 0], sizes = [8, 7, 4], strides = [1, 1, 1]} : vector<8x8x4xf32> to vector<8x7x4xf32>
    %4 = tpu.concatenate %2, %3 in 1 : vector<8x1x4xf32>, vector<8x7x4xf32> -> vector<8x8x4xf32>
    %5 = vector.extract_strided_slice %1 {offsets = [0, 1, 0], sizes = [8, 7, 4], strides = [1, 1, 1]} : vector<8x8x4xf32> to vector<8x7x4xf32>
    %6 = vector.extract_strided_slice %1 {offsets = [0, 0, 0], sizes = [8, 1, 4], strides = [1, 1, 1]} : vector<8x8x4xf32> to vector<8x1x4xf32>
    %7 = tpu.concatenate %5, %6 in 1 : vector<8x7x4xf32>, vector<8x1x4xf32> -> vector<8x8x4xf32>
    %8 = tpu.concatenate %4, %1, %7 in 2 : vector<8x8x4xf32>, vector<8x8x4xf32>, vector<8x8x4xf32> -> vector<8x8x12xf32>
    %9 = vector.shape_cast %8 : vector<8x8x12xf32> to vector<64x12xf32>
    %10 = arith.truncf %9 : vector<64x12xf32> to vector<64x12xbf16>
    %c0_2 = arith.constant 0 : index
    %c0_3 = arith.constant 0 : index
    %11 = vector.load %arg2[%c0_2, %c0_3] : memref<12x128xbf16, #tpu.memory_space<vmem>>, vector<12x128xbf16>
    %cst = arith.constant dense<0.000000e+00> : vector<64x128xf32>
    %12 = tpu.matmul %10, %11, %cst {dimension_numbers = #tpu.dot_dimension_numbers<[1], [0], [0], [1], [0, 0, 1, 1], [], []>} : vector<64x12xbf16>, vector<12x128xbf16>, vector<64x128xf32> -> vector<64x128xf32>
    %13 = vector.shape_cast %12 : vector<64x128xf32> to vector<8x8x128xf32>
    %c0_4 = arith.constant 0 : index
    %c0_5 = arith.constant 0 : index
    %14 = vector.load %arg3[%c0_4, %c0_5] : memref<8x128xf32, #tpu.memory_space<vmem>>, vector<8x128xf32>
    %15 = vector.shape_cast %14 : vector<8x128xf32> to vector<1x8x128xf32>
    %16 = vector.broadcast %15 : vector<1x8x128xf32> to vector<8x8x128xf32>
    %17 = arith.addf %13, %16 : vector<8x8x128xf32>
    %c0_6 = arith.constant 0 : index
    %c0_7 = arith.constant 0 : index
    %c0_8 = arith.constant 0 : index
    %18 = vector.load %arg4[%c0_6, %c0_7, %c0_8] : memref<8x8x128xf32, #tpu.memory_space<vmem>>, vector<8x8x128xf32>
    tpu.vector_store %arg4[%c0_6, %c0_7, %c0_8], %17 {strides = array<i32>} : memref<8x8x128xf32, #tpu.memory_space<vmem>>, vector<8x8x128xf32>,
    return
  }
  func.func @transform_0(%arg0: i32) -> (i32, i32, i32) {
    %c0_i32 = arith.constant 0 : i32
    %c0_i32_0 = arith.constant 0 : i32
    %c0_i32_1 = arith.constant 0 : i32
    return %arg0, %c0_i32, %c0_i32_0 : i32, i32, i32
  }
  func.func @transform_1(%arg0: i32) -> (i32, i32) {
    %c0_i32 = arith.constant 0 : i32
    %c0_i32_0 = arith.constant 0 : i32
    %c0_i32_1 = arith.constant 0 : i32
    return %c0_i32, %c0_i32_0 : i32, i32
  }
  func.func @transform_2(%arg0: i32) -> (i32, i32) {
    %c0_i32 = arith.constant 0 : i32
    %c0_i32_0 = arith.constant 0 : i32
    %c0_i32_1 = arith.constant 0 : i32
    return %c0_i32, %c0_i32_0 : i32, i32
  }
  func.func @transform_3(%arg0: i32) -> (i32, i32, i32) {
    %c0_i32 = arith.constant 0 : i32
    %c0_i32_0 = arith.constant 0 : i32
    %c0_i32_1 = arith.constant 0 : i32
    return %arg0, %c0_i32, %c0_i32_0 : i32, i32, i32
  }
}

</mosaic_0001>

<bundles_post_ra>
// kernel: tpu_custom_call.1
= control target key start
LH: loop header
LB: loop body
LE: loop exit
PB: predicated region body
PF: predicated region fallthrough
CT: control target
= control target key end

     0   :  { %8 = vsyncpa [#allocation3], 0  ;;  %s838_s0 = inlined_call_operand.vmem [shape: bf16[16,8,4], index: 0, kind: input, shape index: {}]   ;;  %s839_s1 = inlined_call_operand.vmem [shape: bf16[12,128], index: 1, kind: input, shape index: {}]   ;;  %s840_s2 = inlined_call_operand.vmem [shape: f32[8,128], index: 2, kind: input, shape index: {}]   ;;  %s841_s3 = inlined_call_operand.hbm [shape: f32[16,8,128], index: 3, kind: output, shape index: {}]  }
   0x1   :  { %10 = vsyncpa [#allocation3 + $0x1], 0  ;;  %s686_s12 = smov 0   ;;  %s688_s13 = smov 0  }
   0x2   :  { %s690_s14 = smov 0   ;;  %s692_s15 = smov 0  }
   0x3 LB: > { %s707_s16 = sadd.s32 4294967295, %s661_s15   ;;  %s473_s17 = sadd.s32 4294967294, %s661_s15   ;;  %s661_s15 = sphi %s692_s15, %s847_s15   ;;  %s657_s14 = sphi %s690_s14, %s846_s14   ;;  %s653_s13 = sphi %s688_s13, %s845_s13   ;;  %s649_s12 = sphi %s686_s12, %s844_s12  }
   0x4   : > { %s711_s18 = sadd.s32 1, %s661_s15   ;;  %s91_s19 = sadd.s32 1, %s657_s14 }
   0x5   : > { %s88_s20 = ssub.s32 %s661_s15, %s711_s18  ;;  %p101_p0 = scmp.ne.s32.totalorder %s657_s14, %s653_s13 }
   0x6   : > { %p89_p1 = scmp.eq.s32.totalorder %s88_s20, 0  ;;  %p102_p2 = scmp.eq.s32.totalorder %s707_s16, 1 }
   0x7   : > { %p107_p3 = scmp.ne.s32.totalorder %s653_s13, %s649_s12  ;;  %p108_p4 = scmp.eq.s32.totalorder %s473_s17, 1 }
   0x8   : > { %s722_s21 = scalar_select %p89_p1, %s657_s14, %s91_s19  }
   0x9   : > { %p724_p5 = por %p102_p2, %p101_p0  ;;  %p728_p6 = por %p108_p4, %p107_p3 }
   0xa   : > { %p476_p7 = scmp.ge.s32.totalorder %s661_s15, 1  ;;  %p141_p8 = scmp.lt.s32.totalorder %s661_s15, 3 }
   0xc   : > { %p142_p9 = pnand %p476_p7, %p141_p8 }
   0xd   : > { %s478_s24 = sshll.u32 (!%p142_p9), %s707_s16, 3  ;;  %s663_s29 = smov (!%p142_p9), 4  }
   0xe   : > { %145 = sbr.rel (%p142_p9) target bundleno = 305 (0x131), region = 32  ;;  %p166_p10 = scmp.lt.s32.totalorder (!%p142_p9), %s478_s24, 15 }
   0xf   : > { %s664_s30 = smov (!%p142_p9), 8   ;;  %s162_s8 = sand.u32 (!%p142_p9), 1, %s653_s13  }
  0x10   : > { %s477_s9 = sshll.u32 (!%p142_p9), %s162_s8, 6  ;;  %s494_s19 = sshll.u32 (!%p142_p9), %s707_s16, 6 }
  0x11   : > { %s164_s17 = scalar_lea.vmem (!%p142_p9), [#allocation2], %s477_s9  ;;  %s396_s16 = scalar_lea.sflag (!%p142_p9), [#allocation3], %s162_s8 }
  0x12   : > { %s408_s26 = sshll.u32 (!%p142_p9), %s164_s17, 4  ;;  %s619_s6 = scalar_lea.hbm (!%p142_p9), %s841_s3, 128  ;;  %s409_s26 = int_to_ptr.vmem [resolvable:$true] %s408_s26 }
  0x13   : > { %s849_s24 = smov (!%p166_p10, %s478_s24), 15  ;;  %v482_v28 = vld [vmem:[%s839_s1] sm:$0xf]  ;;  %v493_v29 = vld [vmem:[%s839_s1] sm:$0x30]  ;;  %vm345_vm0 = vcmask 1045504  }
  0x14   : > { %s479_s25 = sshll.u32 %s849_s24, 2  ;;  %v483_v30 = vor.u32 %v493_v29, %v482_v28  ;;  %vm303_vm1 = vcmask 31744   ;;  %vm312_vm2 = vcmask 64512   ;;  %vm332_vm3 = vcmask 97280  }
  0x15   : > { %s169_s28 = scalar_lea.vmem %s838_s0, %s479_s25  ;;  %s407_s25 = scalar_lea.hbm %s841_s3, %s494_s19 }
  0x16   : > { %v512_v0 = vld [vmem:[%s169_s28 + $0x10] sm:$0xff]   ;;  %v513_v1 = vld [vmem:[%s169_s28 + $0x18] sm:$0xff]   ;;  %v496_v4 = vld [vmem:[%s169_s28] sm:$0xff]   ;;  %v347_v31 = vsel %vm345_vm0, %v483_v30, 0  ;;  %s410_s27 = sshll.u32 %s407_s25, 4  ;;  %s411_s27 = int_to_ptr.hbm [resolvable:$true] %s410_s27 }
  0x17   : > { %v505_v2 = vunpack.c.l.bf16 %v512_v0  ;;  %v506_v3 = vunpack.c.h.bf16 %v512_v0  ;;  %v738_v7 = vunpack.c.l.bf16 %v513_v1  ;;  %v740_v9 = vunpack.c.h.bf16 %v513_v1  ;;  %v511_v14 = vld [vmem:[%s169_s28 + $0x8] sm:$0xff]   ;;  %515 = vmatpush.bf16.msra.mxu2 %v347_v31  ;;  %516 = vmatpush.bf16.msra.mxu3 %v347_v31  ;;  %s613_s28 = sshra.s32 %s411_s27, 4  ;;  %s614_s28 = int_to_ptr.hbm [resolvable:$true] %s613_s28 }
  0x18   : > { %v742_v10 = vunpack.c.l.bf16 %v496_v4  ;;  %v744_v11 = vunpack.c.h.bf16 %v496_v4  ;;  %v753_v18 = vunpack.c.l.bf16 %v511_v14  ;;  %v755_v19 = vunpack.c.h.bf16 %v511_v14  ;;  %356 = vmatpush.bf16.msra.mxu0 %v347_v31  ;;  %514 = vmatpush.bf16.msra.mxu1 %v347_v31  ;;  %p620_p0 = scmp.lt.s32.totalorder %s614_s28, %s841_s3 }
  0x19   : > { %v559_v5 = vpack.i.bf16 %v506_v3, %v505_v2  ;;  %v226_v6 = vrot.slane %v505_v2, 1  ;;  %v227_v8 = vrot.slane %v506_v3, 1  ;;  %v228_v15 = vrot.slane %v738_v7, 1 }
  0x1a   : > { %v569_v13 = vpack.i.bf16 %v744_v11, %v742_v10  ;;  %v229_v16 = vrot.slane %v740_v9, 1  ;;  %v564_v17 = vpack.i.bf16 %v740_v9, %v738_v7  ;;  %v584_v21 = vpack.i.bf16 %v755_v19, %v753_v18 }
  0x1b   : > { %560 = vrot.lane.b32.xlu0 %v559_v5, %s663_s29  ;;  %v574_v12 = vpack.i.bf16 %v227_v8, %v226_v6  ;;  %v222_v22 = vrot.slane %v742_v10, 1  ;;  %v223_v23 = vrot.slane %v744_v11, 1  ;;  %v224_v24 = vrot.slane %v753_v18, 1 }
  0x1c   : > { %570 = vrot.lane.b32.xlu2 %v569_v13, %s663_s29  ;;  %v579_v20 = vpack.i.bf16 %v229_v16, %v228_v15  ;;  %v225_v25 = vrot.slane %v755_v19, 1  ;;  %v202_v32 = vrot.slane %v506_v3, 7  ;;  %v201_v33 = vrot.slane %v505_v2, 7 }
  0x1d   : > { %575 = vrot.lane.b32.xlu1 %v574_v12, %s664_s30  ;;  %v589_v26 = vpack.i.bf16 %v223_v23, %v222_v22  ;;  %v203_v45 = vrot.slane %v738_v7, 7  ;;  %v204_v46 = vrot.slane %v740_v9, 7  ;;  %v198_v57 = vrot.slane %v744_v11, 7 }
  0x1e   : > { %v594_v27 = vpack.i.bf16 %v225_v25, %v224_v24  ;;  %v197_v59 = vrot.slane %v742_v10, 7  ;;  %v199_v63 = vrot.slane %v753_v18, 7  ;;  %v200_v1 = vrot.slane %v755_v19, 7 }
  0x23   : > { %565 = vrot.lane.b32.xlu0 %v564_v17, %s663_s29 }
  0x24   : > { %585 = vrot.lane.b32.xlu2 %v584_v21, %s663_s29  ;;  %s615_s29 = scalar_lea.hbm %s614_s28, 64 }
  0x25   : > { %580 = vrot.lane.b32.xlu1 %v579_v20, %s664_s30  ;;  %v378_v20 = vld [vmem:[%s840_s2] sm:$0xff]  ;;  %p616_p11 = scmp.ne.s32.totalorder %s614_s28, %s615_s29  ;;  %p621_p1 = scmp.lt.s32.totalorder %s619_s6, %s615_s29 }
  0x27   : > { %p617_p12 = pnand %p616_p11, %p724_p5  ;;  %p622_p2 = por %p621_p1, %p620_p0 }
  0x29   : > { %p618_p13 = pneg %p617_p12 }
  0x2b   : > { %590 = vrot.lane.b32.xlu0 %v589_v26, %s664_s30  ;;  %p623_p3 = pnand %p622_p2, %p618_p13 }
  0x2d   : > { %595 = vrot.lane.b32.xlu1 %v594_v27, %s664_s30 }
  0x76   : > { %v571_v37 = vpop.permute.xlu2 %570 }
  0x77   : > { %v573_v58 = vunpack.i.h.bf16 %v571_v37  ;;  %v572_v60 = vunpack.i.l.bf16 %v571_v37 }
  0x79   : > { %v305_v7 = vsel %vm303_vm1, %v198_v57, %v573_v58  ;;  %v304_v8 = vsel %vm303_vm1, %v197_v59, %v572_v60 }
  0x7e   : > { %v586_v56 = vpop.permute.xlu2 %585 }
  0x7f   : > { %v588_v2 = vunpack.i.h.bf16 %v586_v56  ;;  %v587_v3 = vunpack.i.l.bf16 %v586_v56 }
  0x81   : > { %v307_v9 = vsel %vm303_vm1, %v200_v1, %v588_v2  ;;  %v306_v10 = vsel %vm303_vm1, %v199_v63, %v587_v3 }
  0x8d   : > { %v561_v34 = vpop.permute.xlu0 %560 }
  0x8e   : > { %v563_v35 = vunpack.i.h.bf16 %v561_v34  ;;  %v562_v36 = vunpack.i.l.bf16 %v561_v34 }
  0x8f   : > { %v576_v40 = vpop.permute.xlu1 %575 }
  0x90   : > { %v309_v38 = vsel %vm303_vm1, %v202_v32, %v563_v35  ;;  %v308_v39 = vsel %vm303_vm1, %v201_v33, %v562_v36  ;;  %v578_v41 = vunpack.i.h.bf16 %v576_v40  ;;  %v577_v42 = vunpack.i.l.bf16 %v576_v40 }
  0x92   : > { %v317_v43 = vsel %vm312_vm2, %v308_v39, %v577_v42  ;;  %v318_v44 = vsel %vm312_vm2, %v309_v38, %v578_v41 }
  0x93   : > { %v323_v47 = vpack.c.bf16 %v318_v44, %v317_v43 }
  0x95   : > { %v566_v48 = vpop.permute.xlu0 %565  ;;  %486 = vmatmul.msk.bf16.vlgmr.msra.gmra.mxu2 %vm332_vm3, %v323_v47 }
  0x96   : > { %v568_v49 = vunpack.i.h.bf16 %v566_v48  ;;  %v567_v50 = vunpack.i.l.bf16 %v566_v48 }
  0x97   : > { %v581_v53 = vpop.permute.xlu1 %580 }
  0x98   : > { %v311_v51 = vsel %vm303_vm1, %v204_v46, %v568_v49  ;;  %v310_v52 = vsel %vm303_vm1, %v203_v45, %v567_v50  ;;  %v583_v54 = vunpack.i.h.bf16 %v581_v53  ;;  %v582_v55 = vunpack.i.l.bf16 %v581_v53 }
  0x9a   : > { %v319_v61 = vsel %vm312_vm2, %v310_v52, %v582_v55  ;;  %v320_v62 = vsel %vm312_vm2, %v311_v51, %v583_v54 }
  0x9b   : > { %v324_v0 = vpack.c.bf16 %v320_v62, %v319_v61 }
  0x9d   : > { %v591_v4 = vpop.permute.xlu0 %590  ;;  %487 = vmatmul.msk.bf16.vlgmr.msra.gmra.mxu3 %vm332_vm3, %v324_v0 }
  0x9e   : > { %v593_v5 = vunpack.i.h.bf16 %v591_v4  ;;  %v592_v6 = vunpack.i.l.bf16 %v591_v4 }
  0x9f   : > { %v596_v11 = vpop.permute.xlu1 %595 }
  0xa0   : > { %v313_v12 = vsel %vm312_vm2, %v304_v8, %v592_v6  ;;  %v314_v13 = vsel %vm312_vm2, %v305_v7, %v593_v5  ;;  %v598_v14 = vunpack.i.h.bf16 %v596_v11  ;;  %v597_v15 = vunpack.i.l.bf16 %v596_v11 }
  0xa1   : > { %v321_v16 = vpack.c.bf16 %v314_v13, %v313_v12 }
  0xa2   : > { %v315_v17 = vsel %vm312_vm2, %v306_v10, %v597_v15  ;;  %v316_v18 = vsel %vm312_vm2, %v307_v9, %v598_v14 }
  0xa3   : > { %484 = vmatmul.msk.bf16.vlgmr.msra.gmra.mxu0 %vm332_vm3, %v321_v16  ;;  %v322_v19 = vpack.c.bf16 %v316_v18, %v315_v17 }
  0xa5   : > { %485 = vmatmul.msk.bf16.vlgmr.msra.gmra.mxu1 %vm332_vm3, %v322_v19 }
 0x118   : > { %v368_v21 = vpop.f32.mrf.mxu2 }
 0x119   : > { %v383_v22 = vadd.f32 %v378_v20, %v368_v21 }
 0x11b   : > { %391 = vst [vmem:[%s164_s17 + $0x20] sm:$0xff] %v383_v22 }
 0x120   : > { %v358_v23 = vpop.f32.mrf.mxu0  ;;  %v370_v25 = vpop.f32.mrf.mxu2 }
 0x121   : > { %v379_v24 = vadd.f32 %v378_v20, %v358_v23  ;;  %v373_v26 = vpop.f32.mrf.mxu3  ;;  %v384_v27 = vadd.f32 %v378_v20, %v370_v25 }
 0x122   : > { %v385_v28 = vadd.f32 %v378_v20, %v373_v26  ;;  %v363_v29 = vpop.f32.mrf.mxu1 }
 0x123   : > { %387 = vst [vmem:[%s164_s17] sm:$0xff] %v379_v24  ;;  %v381_v30 = vadd.f32 %v378_v20, %v363_v29 }
 0x124   : > { %392 = vst [vmem:[%s164_s17 + $0x28] sm:$0xff] %v384_v27 }
 0x125   : > { %393 = vst [vmem:[%s164_s17 + $0x30] sm:$0xff] %v385_v28 }
 0x126   : > { %389 = vst [vmem:[%s164_s17 + $0x10] sm:$0xff] %v381_v30 }
 0x128   : > { %v360_v31 = vpop.f32.mrf.mxu0 }
 0x129   : > { %v380_v32 = vadd.f32 %v378_v20, %v360_v31  ;;  %v375_v33 = vpop.f32.mrf.mxu3 }
 0x12a   : > { %v386_v34 = vadd.f32 %v378_v20, %v375_v33  ;;  %v365_v35 = vpop.f32.mrf.mxu1 }
 0x12b   : > { %388 = vst [vmem:[%s164_s17 + $0x8] sm:$0xff] %v380_v32  ;;  %v382_v36 = vadd.f32 %v378_v20, %v365_v35 }
 0x12c   : > { %394 = vst [vmem:[%s164_s17 + $0x38] sm:$0xff] %v386_v34 }
 0x12d   : > { %390 = vst [vmem:[%s164_s17 + $0x18] sm:$0xff] %v382_v36 }
 0x12e   : > { %626 = shalt.err (!%p623_p3)
}
 0x12f   : > { %s665_s8 = smov 128  }
 0x130   : > { %517 = dma.vmem_to_hbm [thread:$0]  (%p724_p5), %s409_s26, 1024, %s411_s27, %s396_s16, %s665_s8, %s665_s8, %s664_s30  }
 0x131 PF: > { %p523_p4 = scmp.ge.s32.totalorder %s661_s15, 2  ;;  %s425_s10 = sand.u32 1, %s649_s12  }
 0x132   : > { %s426_s11 = scalar_lea.sflag [#allocation3], %s425_s10 }
 0x133   : > { %p520_p7 = pnand %p523_p4, %p728_p6 }
 0x135   : > { %p521_p8 = pneg %p520_p7 }
 0x137   : > { %644 = dma.done.wait (%p521_p8), %s426_s11, 1024  }
 0x138   : > { %646 = vsyncadd (%p521_p8), %s426_s11, 4294966272  ;;  %p13_p9 = scmp.ge.s32.totalorder %s711_s18, 4   ;;  %s844_s12 = smov %s653_s13 }
 0x139   : > { %s845_s13 = smov %s657_s14  ;;  %s846_s14 = smov %s722_s21 }
 0x13a   : > { %s847_s15 = smov %s711_s18  ;;  %15 = sbr.rel (!%p13_p9) target bundleno = 3 (0x3), region = 67 }
 0x13f   :  { %432 = vsyncpa [#allocation3], 1 }
 0x140   :  { %434 = vsyncpa [#allocation3 + $0x1], 1 }

</bundles_post_ra>
